<compile_context>
chip_gen: v6e
topology: v6e:2x2x1
jax: 0.10.0
libtpu: 0.0.40
codegen_flags: <defaults>
</compile_context>

<pallas_src>
import functools

import jax
import jax.numpy as jnp
from jax.experimental import pallas as pl
from jax.experimental.pallas import tpu as pltpu


def _round_up(x, m):
    return (x + m - 1) // m * m


# ----------------------------------------------------------------------------
# Fused kernel: per-grid-step = one decode timestep.
# ----------------------------------------------------------------------------
def _decoder_seq_kernel(n_layers, batch, dp,
                        tok_ref,                                   # SMEM [T*B]
                        emb_ref, h0_ref, c0_ref, wih_ref, whh_ref,
                        b_ref, fcw_ref, fcb_ref,                   # VMEM inputs
                        h_ref, c_ref, logits_ref):                 # outputs
    """Padded shapes:
       emb:  [Vr, Dp] f32        h0/c0, h/c: [Nl, Bp, Dp] f32
       wih/whh: [Nl, Dp, 4Dp] bf16    b: [Nl, 1, 4Dp] f32
       fcw: [Dp, Vp] bf16             fcb: [1, Vp] f32
       logits block: [1, Bp, Vp] f32 (per timestep, lane-dense store)
    """
    t = pl.program_id(0)
    bp = h_ref.shape[1]

    # Load initial state into the resident output buffers on the first step.
    @pl.when(t == 0)
    def _():
        h_ref[...] = h0_ref[...]
        c_ref[...] = c0_ref[...]

    # ---- fused embedding lookup from the VMEM-resident table ---------------
    rows = [emb_ref[pl.ds(tok_ref[t * batch + bidx], 1), :]
            for bidx in range(batch)]
    if bp > batch:
        rows.append(jnp.zeros((bp - batch, dp), jnp.float32))
    layer_in = jnp.concatenate(rows, axis=0).astype(jnp.bfloat16)   # [Bp, Dp]
    # TODO(synk): nn.Dropout on embeddings and LSTM inter-layer dropout are
    # omitted (eval-mode identity).

    # ---- stacked LSTM cells (static unroll over layers) --------------------
    for l in range(n_layers):
        gates = (jnp.dot(layer_in, wih_ref[l],
                         preferred_element_type=jnp.float32)
                 + jnp.dot(h_ref[l].astype(jnp.bfloat16), whh_ref[l],
                           preferred_element_type=jnp.float32)
                 + b_ref[l])                     # [Bp,4Dp] (+[1,4Dp] broadcast)
        # PyTorch gate order: i, f, g, o.  Each slice is dp lanes (vreg-aligned).
        i = jax.nn.sigmoid(gates[:, 0 * dp:1 * dp])
        f = jax.nn.sigmoid(gates[:, 1 * dp:2 * dp])
        g = jnp.tanh(gates[:, 2 * dp:3 * dp])
        o = jax.nn.sigmoid(gates[:, 3 * dp:4 * dp])
        c_new = f * c_ref[l] + i * g
        h_new = o * jnp.tanh(c_new)
        h_ref[l] = h_new
        c_ref[l] = c_new
        layer_in = h_new.astype(jnp.bfloat16)    # cast once where produced

    # ---- output Linear (lane-dense Vp-wide store) ---------------------------
    logits_ref[0] = (jnp.dot(layer_in, fcw_ref[...],
                             preferred_element_type=jnp.float32)
                     + fcb_ref[...])


# ----------------------------------------------------------------------------
# Parameters
# ----------------------------------------------------------------------------
def init_params(key, output_dim, emb_dim, hid_dim, n_layers):
    """Unpadded parameters (PyTorch-style uniform +-1/sqrt(H) for LSTM/Linear)."""
    bound = 1.0 / float(hid_dim) ** 0.5

    def unif(k, shape):
        return jax.random.uniform(k, shape, jnp.float32, -bound, bound)

    keys = iter(jax.random.split(key, 4 * n_layers + 8))
    params = {
        "embedding": jax.random.normal(next(keys), (output_dim, emb_dim),
                                       jnp.float32),
        "fc_w": unif(next(keys), (hid_dim, output_dim)),
        "fc_b": unif(next(keys), (output_dim,)),
        "layers": [],
    }
    for l in range(n_layers):
        in_dim = emb_dim if l == 0 else hid_dim
        params["layers"].append({
            "wih": unif(next(keys), (in_dim, 4 * hid_dim)),
            "whh": unif(next(keys), (hid_dim, 4 * hid_dim)),
            "b_ih": unif(next(keys), (4 * hid_dim,)),
            "b_hh": unif(next(keys), (4 * hid_dim,)),
        })
    return params


def pad_params(params, emb_dim, hid_dim, output_dim, n_layers):
    """One-time prep: pad to (8,128)-friendly shapes, split Wih/Whh, fold
    biases into a [Nl,1,4Dp] row, cast matmul weights to bf16."""
    Dp = _round_up(max(emb_dim, hid_dim), 128)
    Vp = _round_up(output_dim, 128)
    Vr = _round_up(output_dim, 8)
    H = hid_dim

    emb_p = jnp.zeros((Vr, Dp), jnp.float32)
    emb_p = emb_p.at[:output_dim, :emb_dim].set(params["embedding"])

    wih_p = jnp.zeros((n_layers, Dp, 4 * Dp), jnp.float32)
    whh_p = jnp.zeros((n_layers, Dp, 4 * Dp), jnp.float32)
    b_p = jnp.zeros((n_layers, 1, 4 * Dp), jnp.float32)
    for l, lp in enumerate(params["layers"]):
        in_dim = lp["wih"].shape[0]
        bias = lp["b_ih"] + lp["b_hh"]
        for k in range(4):
            wih_p = wih_p.at[l, :in_dim, k * Dp:k * Dp + H].set(
                lp["wih"][:, k * H:(k + 1) * H])
            whh_p = whh_p.at[l, :H, k * Dp:k * Dp + H].set(
                lp["whh"][:, k * H:(k + 1) * H])
            # Padded gate columns stay exactly zero (keeps padded state at 0).
            b_p = b_p.at[l, 0, k * Dp:k * Dp + H].set(bias[k * H:(k + 1) * H])

    fcw_p = jnp.zeros((Dp, Vp), jnp.float32).at[:H, :output_dim].set(params["fc_w"])
    fcb_p = jnp.zeros((1, Vp), jnp.float32).at[0, :output_dim].set(params["fc_b"])

    return {
        "emb": emb_p,                           # f32  [Vr, Dp]
        "wih": wih_p.astype(jnp.bfloat16),      # bf16 [Nl, Dp, 4Dp]
        "whh": whh_p.astype(jnp.bfloat16),      # bf16 [Nl, Dp, 4Dp]
        "b": b_p,                               # f32  [Nl, 1, 4Dp]
        "fc_w": fcw_p.astype(jnp.bfloat16),     # bf16 [Dp, Vp]
        "fc_b": fcb_p,                          # f32  [1, Vp]
    }


# ----------------------------------------------------------------------------
# Decoder wrappers (single fused pallas_call per decoded sequence)
# ----------------------------------------------------------------------------
def make_decoder(output_dim, emb_dim, hid_dim, n_layers, batch):
    Dp = _round_up(max(emb_dim, hid_dim), 128)
    Vp = _round_up(output_dim, 128)
    Bp = _round_up(max(batch, 8), 8)
    H = hid_dim
    Nl = n_layers

    def _call(padded, tok_flat, h_pad, c_pad, T):
        kernel = functools.partial(_decoder_seq_kernel, n_layers, batch, Dp)
        grid_spec = pltpu.PrefetchScalarGridSpec(
            num_scalar_prefetch=1,
            grid=(T,),
            in_specs=[
                pl.BlockSpec(padded["emb"].shape, lambda t, tok: (0, 0)),
                pl.BlockSpec((Nl, Bp, Dp), lambda t, tok: (0, 0, 0)),      # h0
                pl.BlockSpec((Nl, Bp, Dp), lambda t, tok: (0, 0, 0)),      # c0
                pl.BlockSpec((Nl, Dp, 4 * Dp), lambda t, tok: (0, 0, 0)),  # wih
                pl.BlockSpec((Nl, Dp, 4 * Dp), lambda t, tok: (0, 0, 0)),  # whh
                pl.BlockSpec((Nl, 1, 4 * Dp), lambda t, tok: (0, 0, 0)),   # bias
                pl.BlockSpec((Dp, Vp), lambda t, tok: (0, 0)),             # fc_w
                pl.BlockSpec((1, Vp), lambda t, tok: (0, 0)),              # fc_b
            ],
            out_specs=(
                pl.BlockSpec((Nl, Bp, Dp), lambda t, tok: (0, 0, 0)),      # h
                pl.BlockSpec((Nl, Bp, Dp), lambda t, tok: (0, 0, 0)),      # c
                pl.BlockSpec((1, Bp, Vp), lambda t, tok: (t, 0, 0)),       # logits
            ),
        )
        return pl.pallas_call(
            kernel,
            grid_spec=grid_spec,
            out_shape=(jax.ShapeDtypeStruct((Nl, Bp, Dp), jnp.float32),
                       jax.ShapeDtypeStruct((Nl, Bp, Dp), jnp.float32),
                       jax.ShapeDtypeStruct((T, Bp, Vp), jnp.float32)),
            compiler_params=pltpu.CompilerParams(
                dimension_semantics=("arbitrary",)),
        )(tok_flat, padded["emb"], h_pad, c_pad, padded["wih"], padded["whh"],
          padded["b"], padded["fc_w"], padded["fc_b"])

    def _pad_state(hidden, cell):
        h = jnp.zeros((Nl, Bp, Dp), jnp.float32).at[:, :batch, :H].set(hidden)
        c = jnp.zeros((Nl, Bp, Dp), jnp.float32).at[:, :batch, :H].set(cell)
        return h, c

    @jax.jit
    def decode(padded, tokens, hidden, cell):
        """Teacher-forced decode of a full [T, B] token sequence in ONE kernel.
        State is padded once, carried VMEM-resident across all T steps, and
        sliced once at the end."""
        T = tokens.shape[0]
        h_pad, c_pad = _pad_state(hidden, cell)
        h_new, c_new, logits = _call(
            padded, tokens.reshape(-1).astype(jnp.int32), h_pad, c_pad, T)
        return (logits[:, :batch, :output_dim],
                h_new[:, :batch, :H],
                c_new[:, :batch, :H])

    @jax.jit
    def forward(padded, tok, hidden, cell):
        """Single-step Decoder.forward (PyTorch contract) == decode with T=1."""
        preds, h_new, c_new = decode(padded, tok[None, :], hidden, cell)
        return preds[0], h_new, c_new

    return forward, decode


# ----------------------------------------------------------------------------
# Pure-JAX reference (same padded bf16 params / same math) for validation
# ----------------------------------------------------------------------------
def reference_decode(padded, tokens, hidden, cell, batch, output_dim, hid_dim,
                     n_layers):
    T = tokens.shape[0]
    Dp = padded["wih"].shape[1]
    Bp = _round_up(max(batch, 8), 8)
    H = hid_dim
    h = jnp.zeros((n_layers, Bp, Dp), jnp.float32).at[:, :batch, :H].set(hidden)
    c = jnp.zeros((n_layers, Bp, Dp), jnp.float32).at[:, :batch, :H].set(cell)
    preds = []
    for t in range(T):
        x = jnp.zeros((Bp, Dp), jnp.float32).at[:batch].set(
            jnp.take(padded["emb"], tokens[t], axis=0))
        layer_in = x.astype(jnp.bfloat16)
        h_next, c_next = [], []
        for l in range(n_layers):
            gates = (jnp.dot(layer_in, padded["wih"][l],
                             preferred_element_type=jnp.float32)
                     + jnp.dot(h[l].astype(jnp.bfloat16), padded["whh"][l],
                               preferred_element_type=jnp.float32)
                     + padded["b"][l])
            i = jax.nn.sigmoid(gates[:, 0 * Dp:1 * Dp])
            f = jax.nn.sigmoid(gates[:, 1 * Dp:2 * Dp])
            g = jnp.tanh(gates[:, 2 * Dp:3 * Dp])
            o = jax.nn.sigmoid(gates[:, 3 * Dp:4 * Dp])
            cn = f * c[l] + i * g
            hn = o * jnp.tanh(cn)
            h_next.append(hn)
            c_next.append(cn)
            layer_in = hn.astype(jnp.bfloat16)
        h = jnp.stack(h_next)
        c = jnp.stack(c_next)
        preds.append((jnp.dot(layer_in, padded["fc_w"],
                              preferred_element_type=jnp.float32)
                      + padded["fc_b"])[:batch, :output_dim])
    return jnp.stack(preds), h[:, :batch, :H], c[:, :batch, :H]


# ----------------------------------------------------------------------------
if __name__ == "__main__":
    OUTPUT_DIM = 16   # target vocab
    EMB_DIM = 32
    HID_DIM = 32
    N_LAYERS = 2
    DROPOUT = 0.5     # eval-mode identity (see TODO)
    BATCH = 4
    SEQ_LEN = 8

    key = jax.random.PRNGKey(0)
    k_param, k_tok, k_h, k_c = jax.random.split(key, 4)

    params = init_params(k_param, OUTPUT_DIM, EMB_DIM, HID_DIM, N_LAYERS)
    padded = pad_params(params, EMB_DIM, HID_DIM, OUTPUT_DIM, N_LAYERS)

    tokens = jax.random.randint(k_tok, (SEQ_LEN, BATCH), 0, OUTPUT_DIM,
                                dtype=jnp.int32)
    hidden = 0.1 * jax.random.normal(k_h, (N_LAYERS, BATCH, HID_DIM), jnp.float32)
    cell = 0.1 * jax.random.normal(k_c, (N_LAYERS, BATCH, HID_DIM), jnp.float32)

    forward, decode = make_decoder(OUTPUT_DIM, EMB_DIM, HID_DIM, N_LAYERS, BATCH)

    # --- single-step Decoder.forward (PyTorch contract) ----------------------
    pred1, h1, c1 = jax.block_until_ready(forward(padded, tokens[0], hidden, cell))
    assert pred1.shape == (BATCH, OUTPUT_DIM)
    assert h1.shape == (N_LAYERS, BATCH, HID_DIM)
    assert c1.shape == (N_LAYERS, BATCH, HID_DIM)
    ref_p1, ref_h1, ref_c1 = reference_decode(padded, tokens[:1], hidden, cell,
                                              BATCH, OUTPUT_DIM, HID_DIM, N_LAYERS)
    assert bool(jnp.allclose(pred1, ref_p1[0], atol=2e-2, rtol=2e-2))
    assert bool(jnp.allclose(h1, ref_h1, atol=2e-2, rtol=2e-2))
    assert bool(jnp.allclose(c1, ref_c1, atol=2e-2, rtol=2e-2))

    # --- fully fused teacher-forced decode loop (one pallas_call) ------------
    preds, hT, cT = jax.block_until_ready(decode(padded, tokens, hidden, cell))
    assert preds.shape == (SEQ_LEN, BATCH, OUTPUT_DIM)
    assert hT.shape == (N_LAYERS, BATCH, HID_DIM)
    assert cT.shape == (N_LAYERS, BATCH, HID_DIM)
    assert bool(jnp.all(jnp.isfinite(preds)))

    ref_preds, ref_hT, ref_cT = reference_decode(padded, tokens, hidden, cell,
                                                 BATCH, OUTPUT_DIM, HID_DIM,
                                                 N_LAYERS)
    assert bool(jnp.allclose(preds, ref_preds, atol=2e-2, rtol=2e-2))
    assert bool(jnp.allclose(hT, ref_hT, atol=2e-2, rtol=2e-2))
    assert bool(jnp.allclose(cT, ref_cT, atol=2e-2, rtol=2e-2))

    print("KERNEL_OK")
</pallas_src>

<mosaic_0001>
module attributes {stable_mosaic.version = 11 : i64} {
  func.func @_decoder_seq_kernel(%arg0: i32, %arg1: memref<4xi32, #tpu.memory_space<smem>>, %arg2: memref<16x128xf32, #tpu.memory_space<vmem>>, %arg3: memref<2x8x128xf32, #tpu.memory_space<vmem>>, %arg4: memref<2x8x128xf32, #tpu.memory_space<vmem>>, %arg5: memref<2x128x512xbf16, #tpu.memory_space<vmem>>, %arg6: memref<2x128x512xbf16, #tpu.memory_space<vmem>>, %arg7: memref<2x1x512xf32, #tpu.memory_space<vmem>>, %arg8: memref<128x128xbf16, #tpu.memory_space<vmem>>, %arg9: memref<1x128xf32, #tpu.memory_space<vmem>>, %arg10: memref<2x8x128xf32, #tpu.memory_space<vmem>>, %arg11: memref<2x8x128xf32, #tpu.memory_space<vmem>>, %arg12: memref<1x8x128xf32, #tpu.memory_space<vmem>>) attributes {dimension_semantics = [#tpu.dimension_semantics<arbitrary>], iteration_bounds = array<i64: 1>, scalar_prefetch = 1 : i64, scratch_operands = 0 : i64, tpu.core_type = #tpu.core_type<tc>, window_params = [{pipeline_mode = #tpu.pipeline_mode<synchronous>, transform_indices = @transform_0, window_bounds = array<i64: 16, 128>}, {pipeline_mode = #tpu.pipeline_mode<synchronous>, transform_indices = @transform_1, window_bounds = array<i64: 2, 8, 128>}, {pipeline_mode = #tpu.pipeline_mode<synchronous>, transform_indices = @transform_2, window_bounds = array<i64: 2, 8, 128>}, {pipeline_mode = #tpu.pipeline_mode<synchronous>, transform_indices = @transform_3, window_bounds = array<i64: 2, 128, 512>}, {pipeline_mode = #tpu.pipeline_mode<synchronous>, transform_indices = @transform_4, window_bounds = array<i64: 2, 128, 512>}, {pipeline_mode = #tpu.pipeline_mode<synchronous>, transform_indices = @transform_5, window_bounds = array<i64: 2, 1, 512>}, {pipeline_mode = #tpu.pipeline_mode<synchronous>, transform_indices = @transform_6, window_bounds = array<i64: 128, 128>}, {pipeline_mode = #tpu.pipeline_mode<synchronous>, transform_indices = @transform_7, window_bounds = array<i64: 1, 128>}, {pipeline_mode = #tpu.pipeline_mode<synchronous>, transform_indices = @transform_8, window_bounds = array<i64: 2, 8, 128>}, {pipeline_mode = #tpu.pipeline_mode<synchronous>, transform_indices = @transform_9, window_bounds = array<i64: 2, 8, 128>}, {transform_indices = @transform_10, window_bounds = array<i64: 1, 8, 128>}]} {
    %c0_i32 = arith.constant 0 : i32
    %0 = arith.cmpi eq, %arg0, %c0_i32 : i32
    %1 = arith.extui %0 : i1 to i32
    %c0_i32_0 = arith.constant 0 : i32
    %2 = arith.cmpi ne, %1, %c0_i32_0 : i32
    scf.if %2 {
      %c0_67 = arith.constant 0 : index
      %c0_68 = arith.constant 0 : index
      %c0_69 = arith.constant 0 : index
      %134 = vector.load %arg3[%c0_67, %c0_68, %c0_69] : memref<2x8x128xf32, #tpu.memory_space<vmem>>, vector<2x8x128xf32>
      %c0_70 = arith.constant 0 : index
      %c0_71 = arith.constant 0 : index
      %c0_72 = arith.constant 0 : index
      %135 = vector.load %arg10[%c0_70, %c0_71, %c0_72] : memref<2x8x128xf32, #tpu.memory_space<vmem>>, vector<2x8x128xf32>
      tpu.vector_store %arg10[%c0_70, %c0_71, %c0_72], %134 {strides = array<i32>} : memref<2x8x128xf32, #tpu.memory_space<vmem>>, vector<2x8x128xf32>,
      %c0_73 = arith.constant 0 : index
      %c0_74 = arith.constant 0 : index
      %c0_75 = arith.constant 0 : index
      %136 = vector.load %arg4[%c0_73, %c0_74, %c0_75] : memref<2x8x128xf32, #tpu.memory_space<vmem>>, vector<2x8x128xf32>
      %c0_76 = arith.constant 0 : index
      %c0_77 = arith.constant 0 : index
      %c0_78 = arith.constant 0 : index
      %137 = vector.load %arg11[%c0_76, %c0_77, %c0_78] : memref<2x8x128xf32, #tpu.memory_space<vmem>>, vector<2x8x128xf32>
      tpu.vector_store %arg11[%c0_76, %c0_77, %c0_78], %136 {strides = array<i32>} : memref<2x8x128xf32, #tpu.memory_space<vmem>>, vector<2x8x128xf32>,
    } else {
    }
    %c4_i32 = arith.constant 4 : i32
    %3 = arith.muli %arg0, %c4_i32 : i32
    %c0_i32_1 = arith.constant 0 : i32
    %4 = arith.addi %3, %c0_i32_1 : i32
    %5 = arith.index_cast %4 : i32 to index
    %6 = memref.load %arg1[%5] : memref<4xi32, #tpu.memory_space<smem>>
    %7 = arith.index_cast %6 : i32 to index
    %c0 = arith.constant 0 : index
    %8 = vector.load %arg2[%7, %c0] : memref<16x128xf32, #tpu.memory_space<vmem>>, vector<1x128xf32>
    %c4_i32_2 = arith.constant 4 : i32
    %9 = arith.muli %arg0, %c4_i32_2 : i32
    %c1_i32 = arith.constant 1 : i32
    %10 = arith.addi %9, %c1_i32 : i32
    %11 = arith.index_cast %10 : i32 to index
    %12 = memref.load %arg1[%11] : memref<4xi32, #tpu.memory_space<smem>>
    %13 = arith.index_cast %12 : i32 to index
    %c0_3 = arith.constant 0 : index
    %14 = vector.load %arg2[%13, %c0_3] : memref<16x128xf32, #tpu.memory_space<vmem>>, vector<1x128xf32>
    %c4_i32_4 = arith.constant 4 : i32
    %15 = arith.muli %arg0, %c4_i32_4 : i32
    %c2_i32 = arith.constant 2 : i32
    %16 = arith.addi %15, %c2_i32 : i32
    %17 = arith.index_cast %16 : i32 to index
    %18 = memref.load %arg1[%17] : memref<4xi32, #tpu.memory_space<smem>>
    %19 = arith.index_cast %18 : i32 to index
    %c0_5 = arith.constant 0 : index
    %20 = vector.load %arg2[%19, %c0_5] : memref<16x128xf32, #tpu.memory_space<vmem>>, vector<1x128xf32>
    %c4_i32_6 = arith.constant 4 : i32
    %21 = arith.muli %arg0, %c4_i32_6 : i32
    %c3_i32 = arith.constant 3 : i32
    %22 = arith.addi %21, %c3_i32 : i32
    %23 = arith.index_cast %22 : i32 to index
    %24 = memref.load %arg1[%23] : memref<4xi32, #tpu.memory_space<smem>>
    %25 = arith.index_cast %24 : i32 to index
    %c0_7 = arith.constant 0 : index
    %26 = vector.load %arg2[%25, %c0_7] : memref<16x128xf32, #tpu.memory_space<vmem>>, vector<1x128xf32>
    %cst = arith.constant 0.000000e+00 : f32
    %27 = vector.broadcast %cst : f32 to vector<4x128xf32>
    %28 = tpu.concatenate %8, %14, %20, %26, %27 in 0 : vector<1x128xf32>, vector<1x128xf32>, vector<1x128xf32>, vector<1x128xf32>, vector<4x128xf32> -> vector<8x128xf32>
    %29 = arith.truncf %28 : vector<8x128xf32> to vector<8x128xbf16>
    %c0_8 = arith.constant 0 : index
    %c0_9 = arith.constant 0 : index
    %c0_10 = arith.constant 0 : index
    %30 = vector.load %arg5[%c0_8, %c0_9, %c0_10] : memref<2x128x512xbf16, #tpu.memory_space<vmem>>, vector<1x128x512xbf16>
    %31 = vector.shape_cast %30 : vector<1x128x512xbf16> to vector<128x512xbf16>
    %cst_11 = arith.constant dense<0.000000e+00> : vector<8x512xf32>
    %32 = tpu.matmul %29, %31, %cst_11 {dimension_numbers = #tpu.dot_dimension_numbers<[1], [0], [0], [1], [0, 0, 1, 1], [], []>} : vector<8x128xbf16>, vector<128x512xbf16>, vector<8x512xf32> -> vector<8x512xf32>
    %c0_12 = arith.constant 0 : index
    %c0_13 = arith.constant 0 : index
    %c0_14 = arith.constant 0 : index
    %33 = vector.load %arg10[%c0_12, %c0_13, %c0_14] : memref<2x8x128xf32, #tpu.memory_space<vmem>>, vector<1x8x128xf32>
    %34 = vector.shape_cast %33 : vector<1x8x128xf32> to vector<8x128xf32>
    %35 = arith.truncf %34 : vector<8x128xf32> to vector<8x128xbf16>
    %c0_15 = arith.constant 0 : index
    %c0_16 = arith.constant 0 : index
    %c0_17 = arith.constant 0 : index
    %36 = vector.load %arg6[%c0_15, %c0_16, %c0_17] : memref<2x128x512xbf16, #tpu.memory_space<vmem>>, vector<1x128x512xbf16>
    %37 = vector.shape_cast %36 : vector<1x128x512xbf16> to vector<128x512xbf16>
    %cst_18 = arith.constant dense<0.000000e+00> : vector<8x512xf32>
    %38 = tpu.matmul %35, %37, %cst_18 {dimension_numbers = #tpu.dot_dimension_numbers<[1], [0], [0], [1], [0, 0, 1, 1], [], []>} : vector<8x128xbf16>, vector<128x512xbf16>, vector<8x512xf32> -> vector<8x512xf32>
    %39 = arith.addf %32, %38 : vector<8x512xf32>
    %c0_19 = arith.constant 0 : index
    %c0_20 = arith.constant 0 : index
    %c0_21 = arith.constant 0 : index
    %40 = vector.load %arg7[%c0_19, %c0_20, %c0_21] : memref<2x1x512xf32, #tpu.memory_space<vmem>>, vector<1x1x512xf32>
    %41 = vector.shape_cast %40 : vector<1x1x512xf32> to vector<1x512xf32>
    %42 = vector.broadcast %41 : vector<1x512xf32> to vector<8x512xf32>
    %43 = arith.addf %39, %42 : vector<8x512xf32>
    %44 = vector.extract_strided_slice %43 {offsets = [0, 0], sizes = [8, 128], strides = [1, 1]} : vector<8x512xf32> to vector<8x128xf32>
    %45 = arith.negf %44 : vector<8x128xf32>
    %46 = math.exp %45 : vector<8x128xf32>
    %cst_22 = arith.constant 1.000000e+00 : f32
    %47 = vector.broadcast %cst_22 : f32 to vector<8x128xf32>
    %48 = arith.addf %47, %46 : vector<8x128xf32>
    %49 = arith.divf %47, %48 : vector<8x128xf32>
    %50 = vector.extract_strided_slice %43 {offsets = [0, 128], sizes = [8, 128], strides = [1, 1]} : vector<8x512xf32> to vector<8x128xf32>
    %51 = arith.negf %50 : vector<8x128xf32>
    %52 = math.exp %51 : vector<8x128xf32>
    %cst_23 = arith.constant 1.000000e+00 : f32
    %53 = vector.broadcast %cst_23 : f32 to vector<8x128xf32>
    %54 = arith.addf %53, %52 : vector<8x128xf32>
    %55 = arith.divf %53, %54 : vector<8x128xf32>
    %56 = vector.extract_strided_slice %43 {offsets = [0, 256], sizes = [8, 128], strides = [1, 1]} : vector<8x512xf32> to vector<8x128xf32>
    %57 = math.tanh %56 : vector<8x128xf32>
    %58 = vector.extract_strided_slice %43 {offsets = [0, 384], sizes = [8, 128], strides = [1, 1]} : vector<8x512xf32> to vector<8x128xf32>
    %59 = arith.negf %58 : vector<8x128xf32>
    %60 = math.exp %59 : vector<8x128xf32>
    %cst_24 = arith.constant 1.000000e+00 : f32
    %61 = vector.broadcast %cst_24 : f32 to vector<8x128xf32>
    %62 = arith.addf %61, %60 : vector<8x128xf32>
    %63 = arith.divf %61, %62 : vector<8x128xf32>
    %c0_25 = arith.constant 0 : index
    %c0_26 = arith.constant 0 : index
    %c0_27 = arith.constant 0 : index
    %64 = vector.load %arg11[%c0_25, %c0_26, %c0_27] : memref<2x8x128xf32, #tpu.memory_space<vmem>>, vector<1x8x128xf32>
    %65 = vector.shape_cast %64 : vector<1x8x128xf32> to vector<8x128xf32>
    %66 = arith.mulf %55, %65 : vector<8x128xf32>
    %67 = arith.mulf %49, %57 : vector<8x128xf32>
    %68 = arith.addf %66, %67 : vector<8x128xf32>
    %69 = math.tanh %68 : vector<8x128xf32>
    %70 = arith.mulf %63, %69 : vector<8x128xf32>
    %c0_28 = arith.constant 0 : index
    %c0_29 = arith.constant 0 : index
    %c0_30 = arith.constant 0 : index
    %71 = vector.load %arg10[%c0_28, %c0_29, %c0_30] : memref<2x8x128xf32, #tpu.memory_space<vmem>>, vector<1x8x128xf32>
    %72 = vector.shape_cast %71 : vector<1x8x128xf32> to vector<8x128xf32>
    %73 = vector.shape_cast %70 : vector<8x128xf32> to vector<1x8x128xf32>
    tpu.vector_store %arg10[%c0_28, %c0_29, %c0_30], %73 {strides = array<i32>} : memref<2x8x128xf32, #tpu.memory_space<vmem>>, vector<1x8x128xf32>,
    %c0_31 = arith.constant 0 : index
    %c0_32 = arith.constant 0 : index
    %c0_33 = arith.constant 0 : index
    %74 = vector.load %arg11[%c0_31, %c0_32, %c0_33] : memref<2x8x128xf32, #tpu.memory_space<vmem>>, vector<1x8x128xf32>
    %75 = vector.shape_cast %74 : vector<1x8x128xf32> to vector<8x128xf32>
    %76 = vector.shape_cast %68 : vector<8x128xf32> to vector<1x8x128xf32>
    tpu.vector_store %arg11[%c0_31, %c0_32, %c0_33], %76 {strides = array<i32>} : memref<2x8x128xf32, #tpu.memory_space<vmem>>, vector<1x8x128xf32>,
    %77 = arith.truncf %70 : vector<8x128xf32> to vector<8x128xbf16>
    %c1 = arith.constant 1 : index
    %c0_34 = arith.constant 0 : index
    %c0_35 = arith.constant 0 : index
    %78 = vector.load %arg5[%c1, %c0_34, %c0_35] : memref<2x128x512xbf16, #tpu.memory_space<vmem>>, vector<1x128x512xbf16>
    %79 = vector.shape_cast %78 : vector<1x128x512xbf16> to vector<128x512xbf16>
    %cst_36 = arith.constant dense<0.000000e+00> : vector<8x512xf32>
    %80 = tpu.matmul %77, %79, %cst_36 {dimension_numbers = #tpu.dot_dimension_numbers<[1], [0], [0], [1], [0, 0, 1, 1], [], []>} : vector<8x128xbf16>, vector<128x512xbf16>, vector<8x512xf32> -> vector<8x512xf32>
    %c1_37 = arith.constant 1 : index
    %c0_38 = arith.constant 0 : index
    %c0_39 = arith.constant 0 : index
    %81 = vector.load %arg10[%c1_37, %c0_38, %c0_39] : memref<2x8x128xf32, #tpu.memory_space<vmem>>, vector<1x8x128xf32>
    %82 = vector.shape_cast %81 : vector<1x8x128xf32> to vector<8x128xf32>
    %83 = arith.truncf %82 : vector<8x128xf32> to vector<8x128xbf16>
    %c1_40 = arith.constant 1 : index
    %c0_41 = arith.constant 0 : index
    %c0_42 = arith.constant 0 : index
    %84 = vector.load %arg6[%c1_40, %c0_41, %c0_42] : memref<2x128x512xbf16, #tpu.memory_space<vmem>>, vector<1x128x512xbf16>
    %85 = vector.shape_cast %84 : vector<1x128x512xbf16> to vector<128x512xbf16>
    %cst_43 = arith.constant dense<0.000000e+00> : vector<8x512xf32>
    %86 = tpu.matmul %83, %85, %cst_43 {dimension_numbers = #tpu.dot_dimension_numbers<[1], [0], [0], [1], [0, 0, 1, 1], [], []>} : vector<8x128xbf16>, vector<128x512xbf16>, vector<8x512xf32> -> vector<8x512xf32>
    %87 = arith.addf %80, %86 : vector<8x512xf32>
    %c1_44 = arith.constant 1 : index
    %c0_45 = arith.constant 0 : index
    %c0_46 = arith.constant 0 : index
    %88 = vector.load %arg7[%c1_44, %c0_45, %c0_46] : memref<2x1x512xf32, #tpu.memory_space<vmem>>, vector<1x1x512xf32>
    %89 = vector.shape_cast %88 : vector<1x1x512xf32> to vector<1x512xf32>
    %90 = vector.broadcast %89 : vector<1x512xf32> to vector<8x512xf32>
    %91 = arith.addf %87, %90 : vector<8x512xf32>
    %92 = vector.extract_strided_slice %91 {offsets = [0, 0], sizes = [8, 128], strides = [1, 1]} : vector<8x512xf32> to vector<8x128xf32>
    %93 = arith.negf %92 : vector<8x128xf32>
    %94 = math.exp %93 : vector<8x128xf32>
    %cst_47 = arith.constant 1.000000e+00 : f32
    %95 = vector.broadcast %cst_47 : f32 to vector<8x128xf32>
    %96 = arith.addf %95, %94 : vector<8x128xf32>
    %97 = arith.divf %95, %96 : vector<8x128xf32>
    %98 = vector.extract_strided_slice %91 {offsets = [0, 128], sizes = [8, 128], strides = [1, 1]} : vector<8x512xf32> to vector<8x128xf32>
    %99 = arith.negf %98 : vector<8x128xf32>
    %100 = math.exp %99 : vector<8x128xf32>
    %cst_48 = arith.constant 1.000000e+00 : f32
    %101 = vector.broadcast %cst_48 : f32 to vector<8x128xf32>
    %102 = arith.addf %101, %100 : vector<8x128xf32>
    %103 = arith.divf %101, %102 : vector<8x128xf32>
    %104 = vector.extract_strided_slice %91 {offsets = [0, 256], sizes = [8, 128], strides = [1, 1]} : vector<8x512xf32> to vector<8x128xf32>
    %105 = math.tanh %104 : vector<8x128xf32>
    %106 = vector.extract_strided_slice %91 {offsets = [0, 384], sizes = [8, 128], strides = [1, 1]} : vector<8x512xf32> to vector<8x128xf32>
    %107 = arith.negf %106 : vector<8x128xf32>
    %108 = math.exp %107 : vector<8x128xf32>
    %cst_49 = arith.constant 1.000000e+00 : f32
    %109 = vector.broadcast %cst_49 : f32 to vector<8x128xf32>
    %110 = arith.addf %109, %108 : vector<8x128xf32>
    %111 = arith.divf %109, %110 : vector<8x128xf32>
    %c1_50 = arith.constant 1 : index
    %c0_51 = arith.constant 0 : index
    %c0_52 = arith.constant 0 : index
    %112 = vector.load %arg11[%c1_50, %c0_51, %c0_52] : memref<2x8x128xf32, #tpu.memory_space<vmem>>, vector<1x8x128xf32>
    %113 = vector.shape_cast %112 : vector<1x8x128xf32> to vector<8x128xf32>
    %114 = arith.mulf %103, %113 : vector<8x128xf32>
    %115 = arith.mulf %97, %105 : vector<8x128xf32>
    %116 = arith.addf %114, %115 : vector<8x128xf32>
    %117 = math.tanh %116 : vector<8x128xf32>
    %118 = arith.mulf %111, %117 : vector<8x128xf32>
    %c1_53 = arith.constant 1 : index
    %c0_54 = arith.constant 0 : index
    %c0_55 = arith.constant 0 : index
    %119 = vector.load %arg10[%c1_53, %c0_54, %c0_55] : memref<2x8x128xf32, #tpu.memory_space<vmem>>, vector<1x8x128xf32>
    %120 = vector.shape_cast %119 : vector<1x8x128xf32> to vector<8x128xf32>
    %121 = vector.shape_cast %118 : vector<8x128xf32> to vector<1x8x128xf32>
    tpu.vector_store %arg10[%c1_53, %c0_54, %c0_55], %121 {strides = array<i32>} : memref<2x8x128xf32, #tpu.memory_space<vmem>>, vector<1x8x128xf32>,
    %c1_56 = arith.constant 1 : index
    %c0_57 = arith.constant 0 : index
    %c0_58 = arith.constant 0 : index
    %122 = vector.load %arg11[%c1_56, %c0_57, %c0_58] : memref<2x8x128xf32, #tpu.memory_space<vmem>>, vector<1x8x128xf32>
    %123 = vector.shape_cast %122 : vector<1x8x128xf32> to vector<8x128xf32>
    %124 = vector.shape_cast %116 : vector<8x128xf32> to vector<1x8x128xf32>
    tpu.vector_store %arg11[%c1_56, %c0_57, %c0_58], %124 {strides = array<i32>} : memref<2x8x128xf32, #tpu.memory_space<vmem>>, vector<1x8x128xf32>,
    %125 = arith.truncf %118 : vector<8x128xf32> to vector<8x128xbf16>
    %c0_59 = arith.constant 0 : index
    %c0_60 = arith.constant 0 : index
    %126 = vector.load %arg8[%c0_59, %c0_60] : memref<128x128xbf16, #tpu.memory_space<vmem>>, vector<128x128xbf16>
    %cst_61 = arith.constant dense<0.000000e+00> : vector<8x128xf32>
    %127 = tpu.matmul %125, %126, %cst_61 {dimension_numbers = #tpu.dot_dimension_numbers<[1], [0], [0], [1], [0, 0, 1, 1], [], []>} : vector<8x128xbf16>, vector<128x128xbf16>, vector<8x128xf32> -> vector<8x128xf32>
    %c0_62 = arith.constant 0 : index
    %c0_63 = arith.constant 0 : index
    %128 = vector.load %arg9[%c0_62, %c0_63] : memref<1x128xf32, #tpu.memory_space<vmem>>, vector<1x128xf32>
    %129 = vector.broadcast %128 : vector<1x128xf32> to vector<8x128xf32>
    %130 = arith.addf %127, %129 : vector<8x128xf32>
    %c0_64 = arith.constant 0 : index
    %c0_65 = arith.constant 0 : index
    %c0_66 = arith.constant 0 : index
    %131 = vector.load %arg12[%c0_64, %c0_65, %c0_66] : memref<1x8x128xf32, #tpu.memory_space<vmem>>, vector<1x8x128xf32>
    %132 = vector.shape_cast %131 : vector<1x8x128xf32> to vector<8x128xf32>
    %133 = vector.shape_cast %130 : vector<8x128xf32> to vector<1x8x128xf32>
    tpu.vector_store %arg12[%c0_64, %c0_65, %c0_66], %133 {strides = array<i32>} : memref<1x8x128xf32, #tpu.memory_space<vmem>>, vector<1x8x128xf32>,
    return
  }
  func.func @transform_0(%arg0: i32, %arg1: memref<4xi32, #tpu.memory_space<smem>>) -> (i32, i32) {
    %c0_i32 = arith.constant 0 : i32
    %c0_i32_0 = arith.constant 0 : i32
    %c0_i32_1 = arith.constant 0 : i32
    return %c0_i32, %c0_i32_0 : i32, i32
  }
  func.func @transform_1(%arg0: i32, %arg1: memref<4xi32, #tpu.memory_space<smem>>) -> (i32, i32, i32) {
    %c0_i32 = arith.constant 0 : i32
    %c0_i32_0 = arith.constant 0 : i32
    %c0_i32_1 = arith.constant 0 : i32
    %c0_i32_2 = arith.constant 0 : i32
    return %c0_i32, %c0_i32_0, %c0_i32_1 : i32, i32, i32
  }
  func.func @transform_2(%arg0: i32, %arg1: memref<4xi32, #tpu.memory_space<smem>>) -> (i32, i32, i32) {
    %c0_i32 = arith.constant 0 : i32
    %c0_i32_0 = arith.constant 0 : i32
    %c0_i32_1 = arith.constant 0 : i32
    %c0_i32_2 = arith.constant 0 : i32
    return %c0_i32, %c0_i32_0, %c0_i32_1 : i32, i32, i32
  }
  func.func @transform_3(%arg0: i32, %arg1: memref<4xi32, #tpu.memory_space<smem>>) -> (i32, i32, i32) {
    %c0_i32 = arith.constant 0 : i32
    %c0_i32_0 = arith.constant 0 : i32
    %c0_i32_1 = arith.constant 0 : i32
    %c0_i32_2 = arith.constant 0 : i32
    return %c0_i32, %c0_i32_0, %c0_i32_1 : i32, i32, i32
  }
  func.func @transform_4(%arg0: i32, %arg1: memref<4xi32, #tpu.memory_space<smem>>) -> (i32, i32, i32) {
    %c0_i32 = arith.constant 0 : i32
    %c0_i32_0 = arith.constant 0 : i32
    %c0_i32_1 = arith.constant 0 : i32
    %c0_i32_2 = arith.constant 0 : i32
    return %c0_i32, %c0_i32_0, %c0_i32_1 : i32, i32, i32
  }
  func.func @transform_5(%arg0: i32, %arg1: memref<4xi32, #tpu.memory_space<smem>>) -> (i32, i32, i32) {
    %c0_i32 = arith.constant 0 : i32
    %c0_i32_0 = arith.constant 0 : i32
    %c0_i32_1 = arith.constant 0 : i32
    %c0_i32_2 = arith.constant 0 : i32
    return %c0_i32, %c0_i32_0, %c0_i32_1 : i32, i32, i32
  }
  func.func @transform_6(%arg0: i32, %arg1: memref<4xi32, #tpu.memory_space<smem>>) -> (i32, i32) {
    %c0_i32 = arith.constant 0 : i32
    %c0_i32_0 = arith.constant 0 : i32
    %c0_i32_1 = arith.constant 0 : i32
    return %c0_i32, %c0_i32_0 : i32, i32
  }
  func.func @transform_7(%arg0: i32, %arg1: memref<4xi32, #tpu.memory_space<smem>>) -> (i32, i32) {
    %c0_i32 = arith.constant 0 : i32
    %c0_i32_0 = arith.constant 0 : i32
    %c0_i32_1 = arith.constant 0 : i32
    return %c0_i32, %c0_i32_0 : i32, i32
  }
  func.func @transform_8(%arg0: i32, %arg1: memref<4xi32, #tpu.memory_space<smem>>) -> (i32, i32, i32) {
    %c0_i32 = arith.constant 0 : i32
    %c0_i32_0 = arith.constant 0 : i32
    %c0_i32_1 = arith.constant 0 : i32
    %c0_i32_2 = arith.constant 0 : i32
    return %c0_i32, %c0_i32_0, %c0_i32_1 : i32, i32, i32
  }
  func.func @transform_9(%arg0: i32, %arg1: memref<4xi32, #tpu.memory_space<smem>>) -> (i32, i32, i32) {
    %c0_i32 = arith.constant 0 : i32
    %c0_i32_0 = arith.constant 0 : i32
    %c0_i32_1 = arith.constant 0 : i32
    %c0_i32_2 = arith.constant 0 : i32
    return %c0_i32, %c0_i32_0, %c0_i32_1 : i32, i32, i32
  }
  func.func @transform_10(%arg0: i32, %arg1: memref<4xi32, #tpu.memory_space<smem>>) -> (i32, i32, i32) {
    %c0_i32 = arith.constant 0 : i32
    %c0_i32_0 = arith.constant 0 : i32
    %c0_i32_1 = arith.constant 0 : i32
    return %arg0, %c0_i32, %c0_i32_0 : i32, i32, i32
  }
}

</mosaic_0001>

<bundles_post_ra>
// kernel: decode.1
= control target key start
LH: loop header
LB: loop body
LE: loop exit
PB: predicated region body
PF: predicated region fallthrough
CT: control target
= control target key end

     0   :  { %s2158_s0 = inlined_call_operand.vmem [shape: s32[4], index: 0, kind: input, shape index: {}]   ;;  %s2159_s1 = inlined_call_operand.vmem [shape: f32[16,128], index: 1, kind: input, shape index: {}]   ;;  %s2160_s2 = inlined_call_operand.vmem [shape: f32[2,8,128], index: 2, kind: input, shape index: {}]   ;;  %s2161_s3 = inlined_call_operand.vmem [shape: f32[2,8,128], index: 3, kind: input, shape index: {}]   ;;  %s2162_s4 = inlined_call_operand.hbm [shape: bf16[2,128,512], index: 4, kind: input, shape index: {}]   ;;  %s2163_s5 = inlined_call_operand.hbm [shape: bf16[2,128,512], index: 5, kind: input, shape index: {}]   ;;  %s2164_s6 = inlined_call_operand.vmem [shape: f32[2,1,512], index: 6, kind: input, shape index: {}]   ;;  %s2165_s7 = inlined_call_operand.hbm [shape: bf16[128,128], index: 7, kind: input, shape index: {}]   ;;  %s2166_s8 = inlined_call_operand.vmem [shape: f32[1,128], index: 8, kind: input, shape index: {}]   ;;  %s2167_s9 = inlined_call_operand.vmem [shape: f32[2,8,128], index: 9, kind: output, shape index: {0}]   ;;  %s2168_s10 = inlined_call_operand.vmem [shape: f32[2,8,128], index: 10, kind: output, shape index: {1}]   ;;  %s2169_s11 = inlined_call_operand.vmem [shape: f32[1,8,128], index: 11, kind: output, shape index: {2}]  }
   0x1   :  { %s17_s19 = sshll.u32 %s2158_s0, 4  ;;  %s18_s19 = int_to_ptr.vmem [resolvable:$true] %s17_s19 }
   0x2   :  { %s1899_s20 = scalar_lea.vmem %s18_s19, 16  ;;  %p1904_p1 = scmp.lt.s32.totalorder %s18_s19, %s18_s19 }
   0x3   :  { %p1900_p0 = scmp.ne.s32.totalorder %s18_s19, %s1899_s20  ;;  %p1905_p2 = scmp.lt.s32.totalorder %s1899_s20, %s1899_s20 }
   0x5   :  { %p1906_p3 = por %p1905_p2, %p1904_p1 }
   0x7   :  { %p1907_p4 = pnand %p1906_p3, %p1900_p0 }
   0x9   :  { %1910 = shalt.err (!%p1907_p4)  }
   0xa   :  { %s1977_s21 = smov [#allocation3]  }
   0xb   :  { %20 = dma.vmem_to_smem %s18_s19, 16, %s1977_s21, [#allocation2] }
   0xc   :  { %1971 = dma.done.wait [#allocation2], 16 }
   0xd   :  { %1972 = vsyncadd [#allocation2], 4294967280 }
   0xe   :  { %22 = sfence }
   0xf   :  { %23 = vsyncpa [#allocation5], 0 }
  0x10   :  { %24 = vsyncpa [#allocation7], 0  ;;  %s1978_s22 = smov [#allocation6]   ;;  %s1979_s24 = smov [#allocation4]  }
  0x11   :  { %s48_s23 = sshll.u32 %s1978_s22, 4  ;;  %s36_s25 = sshll.u32 %s1979_s24, 4  ;;  %s49_s23 = int_to_ptr.vmem [resolvable:$true] %s48_s23  ;;  %s37_s25 = int_to_ptr.vmem [resolvable:$true] %s36_s25 }
  0x12   :  { %s1919_s0 = scalar_lea.vmem %s49_s23, 8192  ;;  %p1924_p6 = scmp.lt.s32.totalorder %s49_s23, %s49_s23 }
  0x13   :  { %p1920_p5 = scmp.ne.s32.totalorder %s49_s23, %s1919_s0  ;;  %p1925_p7 = scmp.lt.s32.totalorder %s1919_s0, %s1919_s0 }
  0x15   :  { %p1926_p8 = por %p1925_p7, %p1924_p6 }
  0x17   :  { %p1927_p9 = pnand %p1926_p8, %p1920_p5 }
  0x19   :  { %1930 = shalt.err (!%p1927_p9)
}
  0x1a   :  { %s1980_s26 = smov 256   ;;  %s1981_s27 = smov 16  }
  0x1b   :  { %54 = dma.hbm_to_vmem [thread:$0]  %s2163_s5, 8192, %s49_s23, [#allocation7], %s1980_s26, %s1980_s26, %s1981_s27  }
  0x1c   :  { %s1939_s30 = scalar_lea.vmem %s37_s25, 8192  ;;  %p1944_p11 = scmp.lt.s32.totalorder %s37_s25, %s37_s25 }
  0x1d   :  { %p1940_p10 = scmp.ne.s32.totalorder %s37_s25, %s1939_s30  ;;  %p1945_p12 = scmp.lt.s32.totalorder %s1939_s30, %s1939_s30 }
  0x1f   :  { %p1946_p13 = por %p1945_p12, %p1944_p11 }
  0x21   :  { %p1947_p0 = pnand %p1946_p13, %p1940_p10 }
  0x23   :  { %1950 = shalt.err (!%p1947_p0)
}
  0x24   :  { %42 = dma.hbm_to_vmem [thread:$0]  %s2162_s4, 8192, %s37_s25, [#allocation5], %s1980_s26, %s1980_s26, %s1981_s27  }
  0x25   :  { %s1982_s14 = smov [#allocation8]  }
  0x26   :  { %s62_s15 = sshll.u32 %s1982_s14, 4  ;;  %s63_s15 = int_to_ptr.vmem [resolvable:$true] %s62_s15 }
  0x27   :  { %s1959_s16 = scalar_lea.vmem %s63_s15, 1024  ;;  %p1964_p2 = scmp.lt.s32.totalorder %s63_s15, %s63_s15 }
  0x28   :  { %p1960_p1 = scmp.ne.s32.totalorder %s63_s15, %s1959_s16  ;;  %p1965_p3 = scmp.lt.s32.totalorder %s1959_s16, %s1959_s16 }
  0x2a   :  { %p1966_p4 = por %p1965_p3, %p1964_p2 }
  0x2c   :  { %p1967_p5 = pnand %p1966_p4, %p1960_p1 }
  0x2e   :  { %1970 = shalt.err (!%p1967_p5)
}
  0x2f   :  { %s1983_s5 = smov 64   ;;  %s1984_s17 = smov 4  }
  0x30   :  { %68 = dma.hbm_to_vmem [thread:$0]  %s2165_s7, 1024, %s63_s15, [#allocation7], %s1983_s5, %s1983_s5, %s1984_s17  }
  0x31   :  { %1973 = dma.done.wait [#allocation5], 8192  }
  0x32   :  { %1974 = vsyncadd [#allocation5], 4294959104 }
  0x33   :  { %1975 = dma.done.wait [#allocation7], 9216  }
  0x34   :  { %1976 = vsyncadd [#allocation7], 4294958080  ;;  %v1985_v0 = vmov 0   ;;  %v1667_v1 = vld [vmem:[#allocation6 + $0xe4] ss:$16 sps:$4 sm:$0xff]   ;;  %s2065_s20 = sld [smem:[#allocation3 + $0x1]] }
  0x35   :  { %385 = vmatprep.mubr.bf16.mxu0 %v1985_v0  ;;  %426 = vmatprep.mubr.bf16.mxu1 %v1985_v0  ;;  %v1669_v2 = vld [vmem:[#allocation6 + $0xec] ss:$16 sps:$4 sm:$0xff]   ;;  %v1671_v3 = vld [vmem:[#allocation6 + $0xe0] ss:$16 sps:$4 sm:$0xff]   ;;  %v1672_v4 = vld [vmem:[#allocation6 + $0xe8] ss:$16 sps:$4 sm:$0xff]  }
  0x36   :  { %353 = vmatprep.subr.bf16.mxu0 %v1667_v1  ;;  %394 = vmatprep.subr.bf16.mxu1 %v1669_v2  ;;  %v1673_v5 = vld [vmem:[#allocation6 + $0xc4] ss:$16 sps:$4 sm:$0xff]   ;;  %v1675_v6 = vld [vmem:[#allocation6 + $0xcc] ss:$16 sps:$4 sm:$0xff]   ;;  %v1677_v7 = vld [vmem:[#allocation6 + $0xc0] ss:$16 sps:$4 sm:$0xff]  }
  0x37   :  { %354 = vmatpush1.bf16.msra.mxu0 %v1671_v3  ;;  %395 = vmatpush1.bf16.msra.mxu1 %v1672_v4  ;;  %v1678_v8 = vld [vmem:[#allocation6 + $0xc8] ss:$16 sps:$4 sm:$0xff]   ;;  %v1679_v9 = vld [vmem:[#allocation6 + $0xa4] ss:$16 sps:$4 sm:$0xff]   ;;  %v1681_v10 = vld [vmem:[#allocation6 + $0xac] ss:$16 sps:$4 sm:$0xff]  }
  0x38   :  { %355 = vmatprep.subr.bf16.mxu0 %v1673_v5  ;;  %396 = vmatprep.subr.bf16.mxu1 %v1675_v6  ;;  %v1683_v11 = vld [vmem:[#allocation6 + $0xa0] ss:$16 sps:$4 sm:$0xff]   ;;  %v1684_v12 = vld [vmem:[#allocation6 + $0xa8] ss:$16 sps:$4 sm:$0xff]   ;;  %v1685_v13 = vld [vmem:[#allocation6 + $0x84] ss:$16 sps:$4 sm:$0xff]  }
  0x39   :  { %v1687_v14 = vld [vmem:[#allocation6 + $0x8c] ss:$16 sps:$4 sm:$0xff]   ;;  %v1689_v15 = vld [vmem:[#allocation6 + $0x80] ss:$16 sps:$4 sm:$0xff]   ;;  %v1690_v16 = vld [vmem:[#allocation6 + $0x88] ss:$16 sps:$4 sm:$0xff]  }
  0x3a   :  { %v1691_v17 = vld [vmem:[#allocation6 + $0x64] ss:$16 sps:$4 sm:$0xff]   ;;  %v1693_v18 = vld [vmem:[#allocation6 + $0x6c] ss:$16 sps:$4 sm:$0xff]   ;;  %v1695_v19 = vld [vmem:[#allocation6 + $0x60] ss:$16 sps:$4 sm:$0xff]   ;;  %s99_s0 = scalar_lea.vmem %s2159_s1, %s2065_s20 }
  0x3b   :  { %356 = vmatpush1.bf16.msra.mxu0 %v1677_v7  ;;  %397 = vmatpush1.bf16.msra.mxu1 %v1678_v8  ;;  %v1696_v20 = vld [vmem:[#allocation6 + $0x68] ss:$16 sps:$4 sm:$0xff]   ;;  %v1697_v21 = vld [vmem:[#allocation6 + $0x44] ss:$16 sps:$4 sm:$0xff]   ;;  %v1699_v22 = vld [vmem:[#allocation6 + $0x4c] ss:$16 sps:$4 sm:$0xff]  }
  0x3c   :  { %357 = vmatprep.subr.bf16.mxu0 %v1679_v9  ;;  %398 = vmatprep.subr.bf16.mxu1 %v1681_v10  ;;  %v1701_v23 = vld [vmem:[#allocation6 + $0x40] ss:$16 sps:$4 sm:$0xff]   ;;  %v1702_v24 = vld [vmem:[#allocation6 + $0x48] ss:$16 sps:$4 sm:$0xff]   ;;  %v1703_v25 = vld [vmem:[#allocation6 + $0x24] ss:$16 sps:$4 sm:$0xff]  }
  0x3d   :  { %v1705_v26 = vld [vmem:[#allocation6 + $0x2c] ss:$16 sps:$4 sm:$0xff]   ;;  %v1707_v27 = vld [vmem:[#allocation6 + $0x20] ss:$16 sps:$4 sm:$0xff]   ;;  %v1708_v28 = vld [vmem:[#allocation6 + $0x28] ss:$16 sps:$4 sm:$0xff]  }
  0x3e   :  { %v1709_v29 = vld [vmem:[#allocation6 + $0x4] ss:$16 sps:$4 sm:$0xff]   ;;  %v1711_v30 = vld [vmem:[#allocation6 + $0xc] ss:$16 sps:$4 sm:$0xff]   ;;  %v1713_v31 = vld [vmem:[#allocation6] ss:$16 sps:$4 sm:$0xff]  }
  0x3f   :  { %358 = vmatpush1.bf16.msra.mxu0 %v1683_v11  ;;  %399 = vmatpush1.bf16.msra.mxu1 %v1684_v12  ;;  %v1714_v32 = vld [vmem:[#allocation6 + $0x8] ss:$16 sps:$4 sm:$0xff]   ;;  %v85_v33 = vld [vmem:[%s2160_s2] sm:$0xff]  ;;  %v1720_v35 = vld [vmem:[#allocation4 + $0xec] ss:$16 sps:$4 sm:$0xff]   ;;  %s2067_s21 = sld [smem:[#allocation3 + $0x2]] }
  0x40   :  { %359 = vmatprep.subr.bf16.mxu0 %v1685_v13  ;;  %400 = vmatprep.subr.bf16.mxu1 %v1687_v14  ;;  %v1717_v34 = vld [vmem:[#allocation4 + $0xe4] ss:$16 sps:$4 sm:$0xff]   ;;  %v160_v36 = vpack.c.bf16 %v85_v33, %v85_v33  ;;  %v1715_v37 = vld [vmem:[#allocation4 + $0xe0] ss:$16 sps:$4 sm:$0xff]   ;;  %v1718_v38 = vld [vmem:[#allocation4 + $0xe8] ss:$16 sps:$4 sm:$0xff]  }
  0x41   :  { %v1723_v39 = vld [vmem:[#allocation4 + $0xc4] ss:$16 sps:$4 sm:$0xff]   ;;  %v1726_v40 = vld [vmem:[#allocation4 + $0xcc] ss:$16 sps:$4 sm:$0xff]   ;;  %v1721_v41 = vld [vmem:[#allocation4 + $0xc0] ss:$16 sps:$4 sm:$0xff]  }
  0x42   :  { %v1724_v42 = vld [vmem:[#allocation4 + $0xc8] ss:$16 sps:$4 sm:$0xff]   ;;  %v1729_v43 = vld [vmem:[#allocation4 + $0xa4] ss:$16 sps:$4 sm:$0xff]   ;;  %v1732_v44 = vld [vmem:[#allocation4 + $0xac] ss:$16 sps:$4 sm:$0xff]  }
  0x43   :  { %360 = vmatpush1.bf16.msra.mxu0 %v1689_v15  ;;  %401 = vmatpush1.bf16.msra.mxu1 %v1690_v16  ;;  %s2071_s22 = sld [smem:[#allocation3]]  ;;  %v1727_v45 = vld [vmem:[#allocation4 + $0xa0] ss:$16 sps:$4 sm:$0xff]   ;;  %v1730_v46 = vld [vmem:[#allocation4 + $0xa8] ss:$16 sps:$4 sm:$0xff]   ;;  %vm118_vm0 = vcmask 1040384  }
  0x44   :  { %361 = vmatprep.subr.bf16.mxu0 %v1691_v17  ;;  %402 = vmatprep.subr.bf16.mxu1 %v1693_v18  ;;  %s2073_s23 = sld [smem:[#allocation3 + $0x3]]  ;;  %v1735_v47 = vld [vmem:[#allocation4 + $0x84] ss:$16 sps:$4 sm:$0xff]   ;;  %v1738_v48 = vld [vmem:[#allocation4 + $0x8c] ss:$16 sps:$4 sm:$0xff]   ;;  %vm124_vm1 = vcmask 1043456  }
  0x45   :  { %v1733_v49 = vld [vmem:[#allocation4 + $0x80] ss:$16 sps:$4 sm:$0xff]   ;;  %v1736_v50 = vld [vmem:[#allocation4 + $0x88] ss:$16 sps:$4 sm:$0xff]   ;;  %v1741_v51 = vld [vmem:[#allocation4 + $0x64] ss:$16 sps:$4 sm:$0xff]   ;;  %s103_s28 = scalar_lea.vmem %s2159_s1, %s2067_s21 }
  0x46   :  { %v1744_v52 = vld [vmem:[#allocation4 + $0x6c] ss:$16 sps:$4 sm:$0xff]   ;;  %v100_v53 = vld [vmem:[%s99_s0] sm:$0x1]  ;;  %v1742_v55 = vld [vmem:[#allocation4 + $0x68] ss:$16 sps:$4 sm:$0xff]  }
  0x47   :  { %362 = vmatpush1.bf16.msra.mxu0 %v1695_v19  ;;  %403 = vmatpush1.bf16.msra.mxu1 %v1696_v20  ;;  %v1739_v54 = vld [vmem:[#allocation4 + $0x60] ss:$16 sps:$4 sm:$0xff]   ;;  %v1747_v56 = vld [vmem:[#allocation4 + $0x44] ss:$16 sps:$4 sm:$0xff]   ;;  %v1750_v57 = vld [vmem:[#allocation4 + $0x4c] ss:$16 sps:$4 sm:$0xff]  }
  0x48   :  { %363 = vmatprep.subr.bf16.mxu0 %v1697_v21  ;;  %404 = vmatprep.subr.bf16.mxu1 %v1699_v22  ;;  %v104_v58 = vld [vmem:[%s103_s28] sm:$0x1]  ;;  %v1748_v61 = vld [vmem:[#allocation4 + $0x48] ss:$16 sps:$4 sm:$0xff]   ;;  %v110_v62 = vrot.slane %v100_v53, 7  ;;  %vm120_vm2 = vcmask 1041408   ;;  %vm2091_vm3 = vmpackc.low %vm124_vm1, %vm124_vm1 }
  0x49   :  { %s95_s12 = scalar_lea.vmem %s2159_s1, %s2071_s22  ;;  %v1745_v60 = vld [vmem:[#allocation4 + $0x40] ss:$16 sps:$4 sm:$0xff]   ;;  %v1753_v63 = vld [vmem:[#allocation4 + $0x24] ss:$16 sps:$4 sm:$0xff]   ;;  %v1756_v1 = vld [vmem:[#allocation4 + $0x2c] ss:$16 sps:$4 sm:$0xff]  }
  0x4a   :  { %s107_s15 = scalar_lea.vmem %s2159_s1, %s2073_s23  ;;  %v96_v59 = vld [vmem:[%s95_s12] sm:$0x1]  ;;  %v113_v3 = vrot.slane %v104_v58, 6  ;;  %v1754_v5 = vld [vmem:[#allocation4 + $0x28] ss:$16 sps:$4 sm:$0xff]   ;;  %vm122_vm4 = vcmask 1042432  }
  0x4b   :  { %364 = vmatpush1.bf16.msra.mxu0 %v1701_v23  ;;  %405 = vmatpush1.bf16.msra.mxu1 %v1702_v24  ;;  %v108_v2 = vld [vmem:[%s107_s15] sm:$0x1]  ;;  %v119_v6 = vsel %vm118_vm0, %v96_v59, %v110_v62  ;;  %v1759_v7 = vld [vmem:[#allocation4 + $0x4] ss:$16 sps:$4 sm:$0xff]   ;;  %v1762_v8 = vld [vmem:[#allocation4 + $0xc] ss:$16 sps:$4 sm:$0xff]  }
  0x4c   :  { %365 = vmatprep.subr.bf16.mxu0 %v1703_v25  ;;  %406 = vmatprep.subr.bf16.mxu1 %v1705_v26  ;;  %v1751_v4 = vld [vmem:[#allocation4 + $0x20] ss:$16 sps:$4 sm:$0xff]   ;;  %v116_v9 = vrot.slane %v108_v2, 5  ;;  %v121_v11 = vsel %vm120_vm2, %v119_v6, %v113_v3  ;;  %v1760_v13 = vld [vmem:[#allocation4 + $0x8] ss:$16 sps:$4 sm:$0xff]   ;;  %vm1987_vm5 = vmmov 0  }
  0x4d   :  { %v1757_v12 = vld [vmem:[#allocation4] ss:$16 sps:$4 sm:$0xff]   ;;  %v1765_v17 = vld [vmem:[#allocation6 + $0x1e4] ss:$16 sps:$4 sm:$0xff]   ;;  %v1769_v19 = vld [vmem:[#allocation6 + $0x1e8] ss:$16 sps:$4 sm:$0xff]  }
  0x4e   :  { %v123_v14 = vsel %vm122_vm4, %v121_v11, %v116_v9  ;;  %v1763_v16 = vld [vmem:[#allocation6 + $0x1e0] ss:$16 sps:$4 sm:$0xff]   ;;  %v1768_v18 = vld [vmem:[#allocation6 + $0x1c4] ss:$16 sps:$4 sm:$0xff]   ;;  %v1771_v20 = vld [vmem:[#allocation6 + $0x1ec] ss:$16 sps:$4 sm:$0xff]  }
  0x4f   :  { %366 = vmatpush1.bf16.msra.mxu0 %v1707_v27  ;;  %407 = vmatpush1.bf16.msra.mxu1 %v1708_v28  ;;  %v1538_v15 = vpack.c.bf16 %v123_v14, %v123_v14  ;;  %v1766_v21 = vld [vmem:[#allocation6 + $0x1c0] ss:$16 sps:$4 sm:$0xff]   ;;  %v1774_v22 = vld [vmem:[#allocation6 + $0x1a4] ss:$16 sps:$4 sm:$0xff]   ;;  %v1777_v24 = vld [vmem:[#allocation6 + $0x1cc] ss:$16 sps:$4 sm:$0xff]  }
  0x50   :  { %367 = vmatprep.subr.bf16.mxu0 %v1709_v29  ;;  %408 = vmatprep.subr.bf16.mxu1 %v1711_v30  ;;  %v1772_v23 = vld [vmem:[#allocation6 + $0x1a0] ss:$16 sps:$4 sm:$0xff]   ;;  %v1775_v25 = vld [vmem:[#allocation6 + $0x1c8] ss:$16 sps:$4 sm:$0xff]   ;;  %v1780_v26 = vld [vmem:[#allocation6 + $0x184] ss:$16 sps:$4 sm:$0xff]  }
  0x51   :  { %v1778_v27 = vld [vmem:[#allocation6 + $0x180] ss:$16 sps:$4 sm:$0xff]   ;;  %v1783_v28 = vld [vmem:[#allocation6 + $0x1ac] ss:$16 sps:$4 sm:$0xff]   ;;  %v1781_v29 = vld [vmem:[#allocation6 + $0x1a8] ss:$16 sps:$4 sm:$0xff]  }
  0x52   :  { %v1786_v30 = vld [vmem:[#allocation6 + $0x164] ss:$16 sps:$4 sm:$0xff]   ;;  %v1787_v33 = vld [vmem:[#allocation6 + $0x188] ss:$16 sps:$4 sm:$0xff]   ;;  %v1828_v59 = vld [vmem:[#allocation4 + $0x1ac] ss:$16 sps:$4 sm:$0xff]  }
  0x53   :  { %368 = vmatpush1.bf16.msra.mxu0 %v1713_v31  ;;  %409 = vmatpush1.bf16.msra.mxu1 %v1714_v32  ;;  %v1784_v31 = vld [vmem:[#allocation6 + $0x160] ss:$16 sps:$4 sm:$0xff]   ;;  %v1789_v32 = vld [vmem:[#allocation6 + $0x18c] ss:$16 sps:$4 sm:$0xff]   ;;  %v1814_v53 = vld [vmem:[#allocation4 + $0x1e8] ss:$16 sps:$4 sm:$0xff]  }
  0x54   :  { %595 = vmatprep.subr.bf16.mxu0 %v1717_v34  ;;  %636 = vmatprep.subr.bf16.mxu1 %v1720_v35  ;;  %v1792_v34 = vld [vmem:[#allocation6 + $0x144] ss:$16 sps:$4 sm:$0xff]   ;;  %v1790_v35 = vld [vmem:[#allocation6 + $0x140] ss:$16 sps:$4 sm:$0xff]   ;;  %v1832_v2 = vld [vmem:[#allocation4 + $0x188] ss:$16 sps:$4 sm:$0xff]  }
  0x55   :  { %v1825_v58 = vld [vmem:[#allocation4 + $0x1a4] ss:$16 sps:$4 sm:$0xff]   ;;  %v1844_v9 = vld [vmem:[#allocation4 + $0x148] ss:$16 sps:$4 sm:$0xff]   ;;  %v1852_v11 = vld [vmem:[#allocation4 + $0x12c] ss:$16 sps:$4 sm:$0xff]  }
  0x56   :  { %386 = vmatmul.mubr.bf16.vlgmr.msra.gmra.mxu0 %v160_v36  ;;  %427 = vmatmul.mubr.bf16.vlgmr.msra.gmra.mxu1 %v160_v36  ;;  %v1795_v36 = vld [vmem:[#allocation6 + $0x16c] ss:$16 sps:$4 sm:$0xff]   ;;  %v1831_v62 = vld [vmem:[#allocation4 + $0x184] ss:$16 sps:$4 sm:$0xff]  }
  0x57   :  { %596 = vmatpush1.bf16.msra.mxu0 %v1715_v37  ;;  %637 = vmatpush1.bf16.msra.mxu1 %v1718_v38  ;;  %v1793_v37 = vld [vmem:[#allocation6 + $0x168] ss:$16 sps:$4 sm:$0xff]   ;;  %v1798_v38 = vld [vmem:[#allocation6 + $0x124] ss:$16 sps:$4 sm:$0xff]  }
  0x58   :  { %597 = vmatprep.subr.bf16.mxu0 %v1723_v39  ;;  %638 = vmatprep.subr.bf16.mxu1 %v1726_v40  ;;  %v1796_v39 = vld [vmem:[#allocation6 + $0x120] ss:$16 sps:$4 sm:$0xff]   ;;  %v1801_v40 = vld [vmem:[#allocation6 + $0x14c] ss:$16 sps:$4 sm:$0xff]   ;;  %v1837_v3 = vld [vmem:[#allocation4 + $0x164] ss:$16 sps:$4 sm:$0xff]  }
  0x59   :  { %627 = vmatprep.mubr.bf16.mxu0 %v1985_v0  ;;  %668 = vmatprep.mubr.bf16.mxu1 %v1985_v0  ;;  %v1843_v6 = vld [vmem:[#allocation4 + $0x144] ss:$16 sps:$4 sm:$0xff]  }
  0x5a   :  { %v1849_v10 = vld [vmem:[#allocation4 + $0x124] ss:$16 sps:$4 sm:$0xff]  }
  0x5b   :  { %598 = vmatpush1.bf16.msra.mxu0 %v1721_v41  ;;  %639 = vmatpush1.bf16.msra.mxu1 %v1724_v42  ;;  %v1799_v41 = vld [vmem:[#allocation6 + $0x148] ss:$16 sps:$4 sm:$0xff]   ;;  %v1804_v42 = vld [vmem:[#allocation6 + $0x104] ss:$16 sps:$4 sm:$0xff]  }
  0x5c   :  { %599 = vmatprep.subr.bf16.mxu0 %v1729_v43  ;;  %640 = vmatprep.subr.bf16.mxu1 %v1732_v44  ;;  %v1802_v43 = vld [vmem:[#allocation6 + $0x100] ss:$16 sps:$4 sm:$0xff]   ;;  %v1807_v44 = vld [vmem:[#allocation6 + $0x12c] ss:$16 sps:$4 sm:$0xff]   ;;  %v1855_v14 = vld [vmem:[#allocation4 + $0x104] ss:$16 sps:$4 sm:$0xff]  }
  0x5f   :  { %600 = vmatpush1.bf16.msra.mxu0 %v1727_v45  ;;  %641 = vmatpush1.bf16.msra.mxu1 %v1730_v46  ;;  %v1805_v45 = vld [vmem:[#allocation6 + $0x128] ss:$16 sps:$4 sm:$0xff]  }
  0x60   :  { %601 = vmatprep.subr.bf16.mxu0 %v1735_v47  ;;  %642 = vmatprep.subr.bf16.mxu1 %v1738_v48  ;;  %v86_v46 = vld [vmem:[%s2160_s2 + $0x8] sm:$0xff] }
  0x61   :  { %v766_v47 = vpack.c.bf16 %v86_v46, %v86_v46  ;;  %v1810_v48 = vld [vmem:[#allocation6 + $0x10c] ss:$16 sps:$4 sm:$0xff]  }
  0x63   :  { %602 = vmatpush1.bf16.msra.mxu0 %v1733_v49  ;;  %643 = vmatpush1.bf16.msra.mxu1 %v1736_v50  ;;  %v1808_v49 = vld [vmem:[#allocation6 + $0x108] ss:$16 sps:$4 sm:$0xff]   ;;  %v1813_v50 = vld [vmem:[#allocation4 + $0x1e4] ss:$16 sps:$4 sm:$0xff]  }
  0x64   :  { %603 = vmatprep.subr.bf16.mxu0 %v1741_v51  ;;  %644 = vmatprep.subr.bf16.mxu1 %v1744_v52  ;;  %v1816_v51 = vld [vmem:[#allocation4 + $0x1ec] ss:$16 sps:$4 sm:$0xff]   ;;  %v1811_v52 = vld [vmem:[#allocation4 + $0x1e0] ss:$16 sps:$4 sm:$0xff]  }
  0x67   :  { %604 = vmatpush1.bf16.msra.mxu0 %v1739_v54  ;;  %645 = vmatpush1.bf16.msra.mxu1 %v1742_v55  ;;  %v1819_v54 = vld [vmem:[#allocation4 + $0x1c4] ss:$16 sps:$4 sm:$0xff]   ;;  %v1822_v55 = vld [vmem:[#allocation4 + $0x1cc] ss:$16 sps:$4 sm:$0xff]  }
  0x68   :  { %605 = vmatprep.subr.bf16.mxu0 %v1747_v56  ;;  %646 = vmatprep.subr.bf16.mxu1 %v1750_v57  ;;  %v1817_v56 = vld [vmem:[#allocation4 + $0x1c0] ss:$16 sps:$4 sm:$0xff]   ;;  %v1820_v57 = vld [vmem:[#allocation4 + $0x1c8] ss:$16 sps:$4 sm:$0xff]  }
  0x6b   :  { %606 = vmatpush1.bf16.msra.mxu0 %v1745_v60  ;;  %647 = vmatpush1.bf16.msra.mxu1 %v1748_v61  ;;  %v1823_v60 = vld [vmem:[#allocation4 + $0x1a0] ss:$16 sps:$4 sm:$0xff]   ;;  %v1826_v61 = vld [vmem:[#allocation4 + $0x1a8] ss:$16 sps:$4 sm:$0xff]  }
  0x6c   :  { %607 = vmatprep.subr.bf16.mxu0 %v1753_v63  ;;  %648 = vmatprep.subr.bf16.mxu1 %v1756_v1  ;;  %v1834_v63 = vld [vmem:[#allocation4 + $0x18c] ss:$16 sps:$4 sm:$0xff]   ;;  %v1829_v1 = vld [vmem:[#allocation4 + $0x180] ss:$16 sps:$4 sm:$0xff]  }
  0x6f   :  { %608 = vmatpush1.bf16.msra.mxu0 %v1751_v4  ;;  %649 = vmatpush1.bf16.msra.mxu1 %v1754_v5  ;;  %v1838_v4 = vld [vmem:[#allocation4 + $0x168] ss:$16 sps:$4 sm:$0xff]   ;;  %v1840_v5 = vld [vmem:[#allocation4 + $0x16c] ss:$16 sps:$4 sm:$0xff]  }
  0x70   :  { %609 = vmatprep.subr.bf16.mxu0 %v1759_v7  ;;  %650 = vmatprep.subr.bf16.mxu1 %v1762_v8  ;;  %v1846_v7 = vld [vmem:[#allocation4 + $0x14c] ss:$16 sps:$4 sm:$0xff]   ;;  %v1841_v8 = vld [vmem:[#allocation4 + $0x140] ss:$16 sps:$4 sm:$0xff]  }
  0x73   :  { %610 = vmatpush1.bf16.msra.mxu0 %v1757_v12  ;;  %651 = vmatpush1.bf16.msra.mxu1 %v1760_v13  ;;  %v1847_v12 = vld [vmem:[#allocation4 + $0x120] ss:$16 sps:$4 sm:$0xff]   ;;  %v1850_v13 = vld [vmem:[#allocation4 + $0x128] ss:$16 sps:$4 sm:$0xff]  }
  0x74   :  { %960 = vmatprep.subr.bf16.mxu0 %v1765_v17  ;;  %1001 = vmatprep.subr.bf16.mxu1 %v1771_v20  ;;  %v1856_v17 = vld [vmem:[#allocation4 + $0x108] ss:$16 sps:$4 sm:$0xff]  }
  0x76   :  { %1539 = vmatmul.mubr.msk.bf16.vlgmr.msra.gmra.mxu0 %vm2091_vm3, %v1538_v15  ;;  %1542 = vmatmul.mubr.msk.bf16.vlgmr.msra.gmra.mxu1 %vm2091_vm3, %v1538_v15  ;;  %v1858_v15 = vld [vmem:[#allocation4 + $0x10c] ss:$16 sps:$4 sm:$0xff]  }
  0x77   :  { %992 = vmatprep.mubr.bf16.mxu0 %v1985_v0  ;;  %1033 = vmatprep.mubr.bf16.mxu1 %v1985_v0 }
  0x78   :  { %961 = vmatpush1.bf16.msra.mxu0 %v1763_v16  ;;  %1002 = vmatpush1.bf16.msra.mxu1 %v1769_v19  ;;  %v1853_v16 = vld [vmem:[#allocation4 + $0x100] ss:$16 sps:$4 sm:$0xff]  }
  0x79   :  { %962 = vmatprep.subr.bf16.mxu0 %v1768_v18  ;;  %1003 = vmatprep.subr.bf16.mxu1 %v1777_v24 }
  0x7c   :  { %963 = vmatpush1.bf16.msra.mxu0 %v1766_v21  ;;  %1004 = vmatpush1.bf16.msra.mxu1 %v1775_v25 }
  0x7d   :  { %964 = vmatprep.subr.bf16.mxu0 %v1774_v22  ;;  %1005 = vmatprep.subr.bf16.mxu1 %v1783_v28 }
  0x80   :  { %965 = vmatpush1.bf16.msra.mxu0 %v1772_v23  ;;  %1006 = vmatpush1.bf16.msra.mxu1 %v1781_v29  ;;  %v677_v29 = vld [vmem:[%s2164_s6] sm:$0xf] }
  0x81   :  { %966 = vmatprep.subr.bf16.mxu0 %v1780_v26  ;;  %1007 = vmatprep.subr.bf16.mxu1 %v1789_v32  ;;  %v679_v26 = vlaneseq }
  0x84   :  { %967 = vmatpush1.bf16.msra.mxu0 %v1778_v27  ;;  %1008 = vmatpush1.bf16.msra.mxu1 %v1787_v33  ;;  %v2106_v27 = vshrl.u32 %v679_v26, 7  ;;  %v1611_v26 = vld [vmem:[%s2164_s6 + $0x4] sm:$0xf] }
  0x85   :  { %968 = vmatprep.subr.bf16.mxu0 %v1786_v30  ;;  %1009 = vmatprep.subr.bf16.mxu1 %v1795_v36 }
  0x86   :  { %v681_v28 = vsub.s32 0, %v2106_v27  ;;  %v685_v30 = vsub.s32 1, %v2106_v27 }
  0x88   :  { %969 = vmatpush1.bf16.msra.mxu0 %v1784_v31  ;;  %1010 = vmatpush1.bf16.msra.mxu1 %v1793_v37  ;;  %v682_v31 = vrot.slane %v677_v29, %v681_v28 }
  0x89   :  { %970 = vmatprep.subr.bf16.mxu0 %v1792_v34  ;;  %1011 = vmatprep.subr.bf16.mxu1 %v1801_v40 }
  0x8c   :  { %971 = vmatpush1.bf16.msra.mxu0 %v1790_v35  ;;  %1012 = vmatpush1.bf16.msra.mxu1 %v1799_v41  ;;  %v686_v35 = vrot.slane %v677_v29, %v685_v30 }
  0x8d   :  { %972 = vmatprep.subr.bf16.mxu0 %v1798_v38  ;;  %1013 = vmatprep.subr.bf16.mxu1 %v1807_v44  ;;  %v693_v44 = vsub.s32 3, %v2106_v27 }
  0x90   :  { %973 = vmatpush1.bf16.msra.mxu0 %v1796_v39  ;;  %1014 = vmatpush1.bf16.msra.mxu1 %v1805_v45 }
  0x91   :  { %974 = vmatprep.subr.bf16.mxu0 %v1804_v42  ;;  %1015 = vmatprep.subr.bf16.mxu1 %v1810_v48 }
  0x94   :  { %975 = vmatpush1.bf16.msra.mxu0 %v1802_v43  ;;  %1016 = vmatpush1.bf16.msra.mxu1 %v1808_v49  ;;  %v694_v49 = vrot.slane %v677_v29, %v693_v44 }
  0x95   :  { %1202 = vmatprep.subr.bf16.mxu0 %v1813_v50  ;;  %1243 = vmatprep.subr.bf16.mxu1 %v1816_v51  ;;  %v689_v50 = vsub.s32 2, %v2106_v27 }
  0x97   :  { %993 = vmatmul.mubr.bf16.vlgmr.msra.gmra.mxu0 %v766_v47  ;;  %1034 = vmatmul.mubr.bf16.vlgmr.msra.gmra.mxu1 %v766_v47 }
  0x98   :  { %1234 = vmatprep.mubr.bf16.mxu0 %v1985_v0  ;;  %1203 = vmatpush1.bf16.msra.mxu0 %v1811_v52 }
  0x99   :  { %1244 = vmatpush1.bf16.msra.mxu1 %v1814_v53  ;;  %1275 = vmatprep.mubr.bf16.mxu1 %v1985_v0  ;;  %v1835_v0 = vld [vmem:[#allocation4 + $0x160] ss:$16 sps:$4 sm:$0xff]   ;;  %v690_v53 = vrot.slane %v677_v29, %v689_v50  ;;  %v1290_v29 = vrot.slane %v1611_v26, %v681_v28 }
  0x9a   :  { %1204 = vmatprep.subr.bf16.mxu0 %v1819_v54  ;;  %1245 = vmatprep.subr.bf16.mxu1 %v1822_v55 }
  0x9c   :  { %1205 = vmatpush1.bf16.msra.mxu0 %v1817_v56 }
  0x9d   :  { %1246 = vmatpush1.bf16.msra.mxu1 %v1820_v57  ;;  %1206 = vmatprep.subr.bf16.mxu0 %v1825_v58 }
  0x9e   :  { %1247 = vmatprep.subr.bf16.mxu1 %v1828_v59 }
  0xa0   :  { %1207 = vmatpush1.bf16.msra.mxu0 %v1823_v60 }
  0xa1   :  { %1248 = vmatpush1.bf16.msra.mxu1 %v1826_v61  ;;  %1208 = vmatprep.subr.bf16.mxu0 %v1831_v62  ;;  %v89_v62 = vld [vmem:[%s2161_s3] sm:$0xff] }
  0xa2   :  { %1249 = vmatprep.subr.bf16.mxu1 %v1834_v63 }
  0xa4   :  { %1209 = vmatpush1.bf16.msra.mxu0 %v1829_v1 }
  0xa5   :  { %1250 = vmatpush1.bf16.msra.mxu1 %v1832_v2  ;;  %1210 = vmatprep.subr.bf16.mxu0 %v1837_v3 }
  0xa6   :  { %1251 = vmatprep.subr.bf16.mxu1 %v1840_v5 }
  0xa8   :  { %1211 = vmatpush1.bf16.msra.mxu0 %v1835_v0 }
  0xa9   :  { %1252 = vmatpush1.bf16.msra.mxu1 %v1838_v4  ;;  %1212 = vmatprep.subr.bf16.mxu0 %v1843_v6 }
  0xaa   :  { %1253 = vmatprep.subr.bf16.mxu1 %v1846_v7 }
  0xac   :  { %1213 = vmatpush1.bf16.msra.mxu0 %v1841_v8 }
  0xad   :  { %1254 = vmatpush1.bf16.msra.mxu1 %v1844_v9  ;;  %1214 = vmatprep.subr.bf16.mxu0 %v1849_v10 }
  0xae   :  { %1255 = vmatprep.subr.bf16.mxu1 %v1852_v11 }
  0xb0   :  { %1215 = vmatpush1.bf16.msra.mxu0 %v1847_v12 }
  0xb1   :  { %1256 = vmatpush1.bf16.msra.mxu1 %v1850_v13  ;;  %1216 = vmatprep.subr.bf16.mxu0 %v1855_v14 }
  0xb2   :  { %1257 = vmatprep.subr.bf16.mxu1 %v1858_v15 }
  0xb4   :  { %1217 = vmatpush1.bf16.msra.mxu0 %v1853_v16 }
  0xb5   :  { %1258 = vmatpush1.bf16.msra.mxu1 %v1856_v17  ;;  %v1859_v17 = vld [vmem:[#allocation8 + $0x38] sm:$0xff]  }
 0x116   :  { %v387_v18 = vpop.f32.mrf.mxu0  ;;  %v428_v19 = vpop.f32.mrf.mxu1 }
 0x118   :  { %v389_v20 = vpop.f32.mrf.mxu0  ;;  %v430_v21 = vpop.f32.mrf.mxu1 }
 0x11a   :  { %v391_v22 = vpop.f32.mrf.mxu0  ;;  %v432_v23 = vpop.f32.mrf.mxu1 }
 0x11b   :  { %v1863_v22 = vld [vmem:[#allocation8 + $0x18] sm:$0xff]   ;;  %v1864_v23 = vld [vmem:[#allocation8 + $0x10] sm:$0xff]  }
 0x11c   :  { %v392_v24 = vpop.f32.mrf.mxu0  ;;  %v433_v25 = vpop.f32.mrf.mxu1 }
 0x11d   :  { %v1865_v24 = vld [vmem:[#allocation8 + $0x8] sm:$0xff]   ;;  %v1866_v25 = vld [vmem:[#allocation8] sm:$0xff]  }
 0x136   :  { %v629_v32 = vpop.f32.mrf.mxu0  ;;  %v670_v33 = vpop.f32.mrf.mxu1 }
 0x137   :  { %v630_v34 = vadd.f32 %v629_v32, %v387_v18  ;;  %v671_v52 = vadd.f32 %v670_v33, %v428_v19  ;;  %v1986_v18 = vmov 0.0   ;;  %v1860_v19 = vld [vmem:[#allocation8 + $0x30] sm:$0xff]  }
 0x138   :  { %v631_v36 = vpop.f32.mrf.mxu0  ;;  %v672_v37 = vpop.f32.mrf.mxu1  ;;  %1636 = vmatprep.subr.bf16.mxu0 %v1986_v18 }
 0x139   :  { %v699_v38 = vadd.f32 %v682_v31, %v630_v34  ;;  %v632_v39 = vadd.f32 %v631_v36, %v389_v20  ;;  %v673_v48 = vadd.f32 %v672_v37, %v430_v21  ;;  %v701_v56 = vadd.f32 %v690_v53, %v671_v52  ;;  %v1861_v20 = vld [vmem:[#allocation8 + $0x28] sm:$0xff]   ;;  %v1862_v21 = vld [vmem:[#allocation8 + $0x20] sm:$0xff]  }
 0x13a   :  { %v633_v40 = vpop.f32.mrf.mxu0  ;;  %v674_v41 = vpop.f32.mrf.mxu1  ;;  %v1294_v34 = vrot.slane %v1611_v26, %v685_v30  ;;  %v1298_v30 = vrot.slane %v1611_v26, %v689_v50 }
 0x13b   :  { %v1543_v42 = vmul.f32 -1.442695, %v699_v38  ;;  %v700_v43 = vadd.f32 %v686_v35, %v632_v39  ;;  %v702_v51 = vadd.f32 %v694_v49, %v673_v48 }
 0x13c   :  { %v634_v45 = vpop.f32.mrf.mxu0  ;;  %v675_v46 = vpop.f32.mrf.mxu1 }
 0x13d   :  { %1867 = vpow2.f32 %v1543_v42  ;;  %v1544_v47 = vmul.f32 -1.442695, %v700_v43  ;;  %v1545_v54 = vmul.f32 -1.442695, %v702_v51 }
 0x13f   :  { %1869 = vpow2.f32 %v1544_v47  ;;  %v1302_v47 = vrot.slane %v1611_v26, %v693_v44  ;;  %v90_v44 = vld [vmem:[%s2161_s3 + $0x8] sm:$0xff] }
 0x140   :  { %1871 = vpow2.f32 %v1545_v54 }
 0x14a   :  { %v1868_v55 = vpop.eup %1867 }
 0x14b   :  { %v706_v57 = vadd.f32 1.0, %v1868_v55 }
 0x14c   :  { %v1870_v58 = vpop.eup %1869 }
 0x14d   :  { %1873 = vrcp.f32 %v706_v57  ;;  %v712_v59 = vadd.f32 1.0, %v1870_v58  ;;  %v1872_v60 = vpop.eup %1871 }
 0x14e   :  { %1875 = vtanh.f32 %v701_v56  ;;  %v719_v2 = vadd.f32 1.0, %v1872_v60 }
 0x14f   :  { %1877 = vrcp.f32 %v712_v59 }
 0x150   :  { %1879 = vrcp.f32 %v719_v2 }
 0x157   :  { %v994_v9 = vpop.f32.mrf.mxu0  ;;  %v1035_v13 = vpop.f32.mrf.mxu1 }
 0x159   :  { %v996_v10 = vpop.f32.mrf.mxu0  ;;  %v1037_v14 = vpop.f32.mrf.mxu1 }
 0x15a   :  { %v1874_v61 = vpop.eup %1873 }
 0x15b   :  { %v1876_v63 = vpop.eup %1875  ;;  %v998_v11 = vpop.f32.mrf.mxu0 }
 0x15c   :  { %v1878_v1 = vpop.eup %1877  ;;  %v724_v0 = vmul.f32 %v1876_v63, %v1874_v61  ;;  %v1039_v15 = vpop.f32.mrf.mxu1 }
 0x15d   :  { %v723_v3 = vmul.f32 %v1878_v1, %v89_v62  ;;  %v1880_v5 = vpop.eup %1879  ;;  %v999_v12 = vpop.f32.mrf.mxu0 }
 0x15e   :  { %v1040_v16 = vpop.f32.mrf.mxu1 }
 0x15f   :  { %v725_v4 = vadd.f32 %v724_v0, %v723_v3  ;;  %v1618_v3 = vld [vmem:[%s2166_s8] ss:$0 sm:$0xff] }
 0x161   :  { %729 = vst [vmem:[%s2168_s10] sm:$0xff] %v725_v4  ;;  %1881 = vtanh.f32 %v725_v4 }
 0x16e   :  { %v1882_v6 = vpop.eup %1881 }
 0x16f   :  { %v727_v7 = vmul.f32 %v1882_v6, %v1880_v5 }
 0x171   :  { %728 = vst [vmem:[%s2167_s9] sm:$0xff] %v727_v7  ;;  %v730_v8 = vpack.c.bf16 %v727_v7, %v727_v7 }
 0x173   :  { %1235 = vmatmul.mubr.bf16.vlgmr.msra.gmra.mxu0 %v730_v8  ;;  %1276 = vmatmul.mubr.bf16.vlgmr.msra.gmra.mxu1 %v730_v8 }
 0x174   :  { %1637 = vmatpush3.bf16.msra.mxu0 %v1859_v17  ;;  %1652 = vmatprep.mubr.msk.bf16.mxu0 %vm1987_vm5, %v1986_v18 }
 0x175   :  { %1638 = vmatprep.subr.bf16.mxu0 %v1986_v18 }
 0x178   :  { %1639 = vmatpush3.bf16.msra.mxu0 %v1860_v19 }
 0x179   :  { %1640 = vmatprep.subr.bf16.mxu0 %v1986_v18 }
 0x17c   :  { %1641 = vmatpush3.bf16.msra.mxu0 %v1861_v20 }
 0x17d   :  { %1642 = vmatprep.subr.bf16.mxu0 %v1986_v18 }
 0x180   :  { %1643 = vmatpush3.bf16.msra.mxu0 %v1862_v21 }
 0x181   :  { %1644 = vmatprep.subr.bf16.mxu0 %v1986_v18 }
 0x184   :  { %1645 = vmatpush3.bf16.msra.mxu0 %v1863_v22 }
 0x185   :  { %1646 = vmatprep.subr.bf16.mxu0 %v1986_v18 }
 0x188   :  { %1647 = vmatpush3.bf16.msra.mxu0 %v1864_v23 }
 0x189   :  { %1648 = vmatprep.subr.bf16.mxu0 %v1986_v18 }
 0x18c   :  { %1649 = vmatpush3.bf16.msra.mxu0 %v1865_v24 }
 0x18d   :  { %1650 = vmatprep.subr.bf16.mxu0 %v1986_v18 }
 0x190   :  { %1651 = vmatpush3.bf16.msra.mxu0 %v1866_v25 }
 0x233   :  { %v1236_v31 = vpop.f32.mrf.mxu0  ;;  %v1277_v32 = vpop.f32.mrf.mxu1 }
 0x234   :  { %v1237_v33 = vadd.f32 %v1236_v31, %v994_v9  ;;  %v1278_v49 = vadd.f32 %v1277_v32, %v1035_v13 }
 0x235   :  { %v1238_v35 = vpop.f32.mrf.mxu0  ;;  %v1279_v36 = vpop.f32.mrf.mxu1 }
 0x236   :  { %v1307_v37 = vadd.f32 %v1290_v29, %v1237_v33  ;;  %v1239_v38 = vadd.f32 %v1238_v35, %v996_v10  ;;  %v1280_v28 = vadd.f32 %v1279_v36, %v1037_v14  ;;  %v1309_v53 = vadd.f32 %v1298_v30, %v1278_v49 }
 0x237   :  { %v1240_v39 = vpop.f32.mrf.mxu0  ;;  %v1281_v40 = vpop.f32.mrf.mxu1 }
 0x238   :  { %v1612_v41 = vmul.f32 -1.442695, %v1307_v37  ;;  %v1308_v42 = vadd.f32 %v1294_v34, %v1239_v38  ;;  %v1310_v48 = vadd.f32 %v1302_v47, %v1280_v28 }
 0x239   :  { %v1241_v43 = vpop.f32.mrf.mxu0  ;;  %v1282_v45 = vpop.f32.mrf.mxu1 }
 0x23a   :  { %1883 = vpow2.f32 %v1612_v41  ;;  %v1613_v46 = vmul.f32 -1.442695, %v1308_v42  ;;  %v1614_v51 = vmul.f32 -1.442695, %v1310_v48 }
 0x23c   :  { %1885 = vpow2.f32 %v1613_v46 }
 0x23d   :  { %1887 = vpow2.f32 %v1614_v51 }
 0x247   :  { %v1884_v52 = vpop.eup %1883 }
 0x248   :  { %v1314_v54 = vadd.f32 1.0, %v1884_v52 }
 0x249   :  { %v1886_v55 = vpop.eup %1885 }
 0x24a   :  { %1889 = vrcp.f32 %v1314_v54  ;;  %v1320_v56 = vadd.f32 1.0, %v1886_v55  ;;  %v1888_v57 = vpop.eup %1887 }
 0x24b   :  { %1891 = vtanh.f32 %v1309_v53  ;;  %v1327_v27 = vadd.f32 1.0, %v1888_v57 }
 0x24c   :  { %1893 = vrcp.f32 %v1320_v56 }
 0x24d   :  { %1895 = vrcp.f32 %v1327_v27 }
 0x257   :  { %v1890_v58 = vpop.eup %1889 }
 0x258   :  { %v1892_v59 = vpop.eup %1891 }
 0x259   :  { %v1894_v60 = vpop.eup %1893  ;;  %v1333_v50 = vmul.f32 %v1892_v59, %v1890_v58 }
 0x25a   :  { %v1332_v61 = vmul.f32 %v1894_v60, %v90_v44  ;;  %v1896_v63 = vpop.eup %1895 }
 0x25c   :  { %v1334_v62 = vadd.f32 %v1333_v50, %v1332_v61 }
 0x25e   :  { %1617 = vst [vmem:[%s2168_s10 + $0x8] sm:$0xff] %v1334_v62  ;;  %1897 = vtanh.f32 %v1334_v62 }
 0x26b   :  { %v1898_v1 = vpop.eup %1897 }
 0x26c   :  { %v1336_v2 = vmul.f32 %v1898_v1, %v1896_v63 }
 0x26e   :  { %1616 = vst [vmem:[%s2167_s9 + $0x8] sm:$0xff] %v1336_v2  ;;  %v1339_v0 = vpack.c.bf16 %v1336_v2, %v1336_v2 }
 0x270   :  { %1653 = vmatmul.mubr.bf16.vlgmr.msra.gmra.mxu0 %v1339_v0 }
 0x330   :  { %v1445_v4 = vpop.f32.mrf.mxu0 }
 0x331   :  { %v1446_v5 = vadd.f32 %v1618_v3, %v1445_v4 }
 0x332   :  { %v1654_v6 = vpop.f32.mrf.mxu0 }
 0x333   :  { %1451 = vst [vmem:[%s2169_s11] sm:$0xff] %v1446_v5 }
 0x334   :  { %v1448_v7 = vpop.f32.mrf.mxu0 }
 0x336   :  { %v1655_v8 = vpop.f32.mrf.mxu0 }
 0x337   :  { %1464 = vsyncpa [#allocation5], 1 }
 0x338   :  { %1465 = vsyncpa [#allocation7], 1 }

</bundles_post_ra>
